<compile_context>
chip_gen: v6e
topology: v6e:2x2x1
jax: 0.10.0
libtpu: 0.0.40
codegen_flags: <defaults>
</compile_context>

<pallas_src>
import jax
import jax.numpy as jnp
from jax.experimental import pallas as pl
from jax.experimental.pallas import tpu as pltpu


def _round_up(x, m):
    return ((x + m - 1) // m) * m


def _fused_mlp_kernel(feat_ref, w123_ref, b123_ref, w4_ref, b4_ref, out_ref):
    # One batch tile per grid step. The three leading linears arrive pre-folded
    # as a single (tab_features, hidden) weight, so this is two MXU matmuls
    # with an f32 bias-add + ReLU in between.
    x = feat_ref[...].astype(w123_ref.dtype)                        # (TB, 22) f32 -> bf16 (VPU cast, free)
    h = jnp.dot(x, w123_ref[...], preferred_element_type=jnp.float32)
    h = jnp.maximum(h + b123_ref[...], 0.0)                         # f32 bias + ReLU on VPU
    # mlp[2] Dropout(0.2) -> identity in eval mode.
    # TODO(synk): training-mode dropout (pltpu.prng_random_bits mask) not implemented.
    out = jnp.dot(h.astype(w4_ref.dtype), w4_ref[...],
                  preferred_element_type=jnp.float32) + b4_ref[...]
    out_ref[...] = out.astype(out_ref.dtype)


def fold_params(params, compute_dtype=jnp.bfloat16):
    """Fold feature_net -> emb -> mlp[0] (pure linear composition) into one linear.

    W123 = W1 @ W2 @ W3,  b123 = ((b1 @ W2 + b2) @ W3 + b3).
    Matmul operands are cast to `compute_dtype`; biases stay f32.
    """
    w123 = params["w1"] @ params["w2"] @ params["w3"]
    b123 = (params["b1"] @ params["w2"] + params["b2"]) @ params["w3"] + params["b3"]
    return {
        "w123": w123.astype(compute_dtype),
        "b123": b123.astype(jnp.float32),
        "w4": params["w4"].astype(compute_dtype),
        "b4": params["b4"].astype(jnp.float32),
    }


def prediction_model_forward(feature, pred, params, *, block_b=512,
                             compute_dtype=jnp.bfloat16):
    """Pallas implementation of PredictionModel.forward. `pred` is unused."""
    del pred  # unused by the reference forward pass
    B, tab_features = feature.shape
    fp = fold_params(params, compute_dtype)
    hidden = fp["w123"].shape[1]
    num_class = fp["w4"].shape[1]

    # Batch tile: multiple of 8 (sublane), capped so double-buffered tiles fit
    # easily in VMEM on all of v5e/v6e/v7x.
    tb = min(block_b, _round_up(B, 8))
    b_pad = _round_up(B, tb)
    n_steps = b_pad // tb

    feat = feature
    if b_pad != B:
        # Rare, only when B % tb != 0; keeps f32 dtype (cast happens in-kernel).
        feat = jnp.pad(feat, ((0, b_pad - B), (0, 0)))

    out = pl.pallas_call(
        _fused_mlp_kernel,
        out_shape=jax.ShapeDtypeStruct((b_pad, num_class), jnp.float32),
        grid=(n_steps,),
        in_specs=[
            pl.BlockSpec((tb, tab_features), lambda i: (i, 0)),      # feature tile (f32)
            pl.BlockSpec((tab_features, hidden), lambda i: (0, 0)),  # W123 (resident)
            pl.BlockSpec((1, hidden), lambda i: (0, 0)),             # b123
            pl.BlockSpec((hidden, num_class), lambda i: (0, 0)),     # W4
            pl.BlockSpec((1, num_class), lambda i: (0, 0)),          # b4
        ],
        out_specs=pl.BlockSpec((tb, num_class), lambda i: (i, 0)),
        compiler_params=pltpu.CompilerParams(
            dimension_semantics=("parallel",)),  # lets v7x shard batch over 2 TCs
    )(feat, fp["w123"], fp["b123"], fp["w4"], fp["b4"])

    return out[:B] if b_pad != B else out


def init_params(key, seq_features=22, tab_features=22, emb_dim=32, hidden=128,
                num_class=10):
    """Deterministic init mirroring the PyTorch module's parameter shapes.

    Weights are stored transposed relative to nn.Linear, i.e. (in, out).
    """
    del seq_features  # unused by the forward pass
    ks = jax.random.split(key, 8)

    def linear(kw, kb, fan_in, fan_out):
        bound = 1.0 / jnp.sqrt(fan_in)
        w = jax.random.uniform(kw, (fan_in, fan_out), jnp.float32, -bound, bound)
        b = jax.random.uniform(kb, (1, fan_out), jnp.float32, -bound, bound)
        return w, b

    w1, b1 = linear(ks[0], ks[1], tab_features, tab_features)  # feature_net
    w2, b2 = linear(ks[2], ks[3], tab_features, emb_dim)       # emb
    w3, b3 = linear(ks[4], ks[5], emb_dim, hidden)             # mlp[0]
    w4, b4 = linear(ks[6], ks[7], hidden, num_class)           # mlp[3]
    return {"w1": w1, "b1": b1, "w2": w2, "b2": b2,
            "w3": w3, "b3": b3, "w4": w4, "b4": b4}


def reference_forward(feature, params):
    """Unfused f32 reference matching the PyTorch module (eval mode)."""
    y = feature @ params["w1"] + params["b1"]
    z = y @ params["w2"] + params["b2"]
    h = jnp.maximum(z @ params["w3"] + params["b3"], 0.0)
    return h @ params["w4"] + params["b4"]


if __name__ == "__main__":
    key = jax.random.PRNGKey(0)
    k_feat, k_pred, k_params, k_big = jax.random.split(key, 4)

    B = 8
    seq_features = 22
    tab_features = 22
    num_class = 10

    feature = jax.random.normal(k_feat, (B, tab_features), jnp.float32)
    pred = jax.random.normal(k_pred, (B, seq_features), jnp.float32)  # unused

    params = init_params(k_params, seq_features=seq_features,
                         tab_features=tab_features, emb_dim=32, hidden=128,
                         num_class=num_class)

    # Small-batch check (single grid step). bf16 operands + folded weights
    # change accumulation order, so compare with a loose tolerance.
    out = prediction_model_forward(feature, pred, params)
    out = jax.block_until_ready(out)
    ref = reference_forward(feature, params)
    assert out.shape == (B, num_class), out.shape
    assert jnp.allclose(out, ref, atol=5e-2, rtol=5e-2), "mismatch vs. JAX reference"

    # Multi-step grid check: exercises batch tiling, padding and pipelining
    # (B=300 rows, TB=64 -> 5 grid steps with 20 padded rows sliced off).
    B2 = 300
    feature2 = jax.random.normal(k_big, (B2, tab_features), jnp.float32)
    out2 = prediction_model_forward(feature2, None, params, block_b=64)
    out2 = jax.block_until_ready(out2)
    ref2 = reference_forward(feature2, params)
    assert out2.shape == (B2, num_class), out2.shape
    assert jnp.allclose(out2, ref2, atol=5e-2, rtol=5e-2), "mismatch (tiled batch)"

    print("KERNEL_OK")
</pallas_src>

<mosaic_0001>
module attributes {stable_mosaic.version = 11 : i64} {
  func.func @_fused_mlp_kernel(%arg0: i32, %arg1: memref<8x22xf32, #tpu.memory_space<vmem>>, %arg2: memref<22x128xbf16, #tpu.memory_space<vmem>>, %arg3: memref<1x128xf32, #tpu.memory_space<vmem>>, %arg4: memref<128x10xbf16, #tpu.memory_space<vmem>>, %arg5: memref<1x10xf32, #tpu.memory_space<vmem>>, %arg6: memref<8x10xf32, #tpu.memory_space<vmem>>) attributes {dimension_semantics = [#tpu.dimension_semantics<parallel>], iteration_bounds = array<i64: 1>, scalar_prefetch = 0 : i64, scratch_operands = 0 : i64, tpu.core_type = #tpu.core_type<tc>, window_params = [{transform_indices = @transform_0, window_bounds = array<i64: 8, 22>}, {pipeline_mode = #tpu.pipeline_mode<synchronous>, transform_indices = @transform_1, window_bounds = array<i64: 22, 128>}, {pipeline_mode = #tpu.pipeline_mode<synchronous>, transform_indices = @transform_2, window_bounds = array<i64: 1, 128>}, {pipeline_mode = #tpu.pipeline_mode<synchronous>, transform_indices = @transform_3, window_bounds = array<i64: 128, 10>}, {pipeline_mode = #tpu.pipeline_mode<synchronous>, transform_indices = @transform_4, window_bounds = array<i64: 1, 10>}, {transform_indices = @transform_5, window_bounds = array<i64: 8, 10>}]} {
    %c0 = arith.constant 0 : index
    %c0_0 = arith.constant 0 : index
    %0 = vector.load %arg1[%c0, %c0_0] : memref<8x22xf32, #tpu.memory_space<vmem>>, vector<8x22xf32>
    %1 = arith.truncf %0 : vector<8x22xf32> to vector<8x22xbf16>
    %c0_1 = arith.constant 0 : index
    %c0_2 = arith.constant 0 : index
    %2 = vector.load %arg2[%c0_1, %c0_2] : memref<22x128xbf16, #tpu.memory_space<vmem>>, vector<22x128xbf16>
    %cst = arith.constant dense<0.000000e+00> : vector<8x128xf32>
    %3 = tpu.matmul %1, %2, %cst {dimension_numbers = #tpu.dot_dimension_numbers<[1], [0], [0], [1], [0, 0, 1, 1], [], []>} : vector<8x22xbf16>, vector<22x128xbf16>, vector<8x128xf32> -> vector<8x128xf32>
    %c0_3 = arith.constant 0 : index
    %c0_4 = arith.constant 0 : index
    %4 = vector.load %arg3[%c0_3, %c0_4] : memref<1x128xf32, #tpu.memory_space<vmem>>, vector<1x128xf32>
    %5 = vector.broadcast %4 : vector<1x128xf32> to vector<8x128xf32>
    %6 = arith.addf %3, %5 : vector<8x128xf32>
    %cst_5 = arith.constant 0.000000e+00 : f32
    %7 = vector.broadcast %cst_5 : f32 to vector<8x128xf32>
    %8 = arith.maximumf %6, %7 : vector<8x128xf32>
    %9 = arith.truncf %8 : vector<8x128xf32> to vector<8x128xbf16>
    %c0_6 = arith.constant 0 : index
    %c0_7 = arith.constant 0 : index
    %10 = vector.load %arg4[%c0_6, %c0_7] : memref<128x10xbf16, #tpu.memory_space<vmem>>, vector<128x10xbf16>
    %cst_8 = arith.constant dense<0.000000e+00> : vector<8x10xf32>
    %11 = tpu.matmul %9, %10, %cst_8 {dimension_numbers = #tpu.dot_dimension_numbers<[1], [0], [0], [1], [0, 0, 1, 1], [], []>} : vector<8x128xbf16>, vector<128x10xbf16>, vector<8x10xf32> -> vector<8x10xf32>
    %c0_9 = arith.constant 0 : index
    %c0_10 = arith.constant 0 : index
    %12 = vector.load %arg5[%c0_9, %c0_10] : memref<1x10xf32, #tpu.memory_space<vmem>>, vector<1x10xf32>
    %13 = vector.broadcast %12 : vector<1x10xf32> to vector<8x10xf32>
    %14 = arith.addf %11, %13 : vector<8x10xf32>
    %c0_11 = arith.constant 0 : index
    %c0_12 = arith.constant 0 : index
    %15 = vector.load %arg6[%c0_11, %c0_12] : memref<8x10xf32, #tpu.memory_space<vmem>>, vector<8x10xf32>
    tpu.vector_store %arg6[%c0_11, %c0_12], %14 {strides = array<i32>} : memref<8x10xf32, #tpu.memory_space<vmem>>, vector<8x10xf32>,
    return
  }
  func.func @transform_0(%arg0: i32) -> (i32, i32) {
    %c0_i32 = arith.constant 0 : i32
    %c0_i32_0 = arith.constant 0 : i32
    return %arg0, %c0_i32 : i32, i32
  }
  func.func @transform_1(%arg0: i32) -> (i32, i32) {
    %c0_i32 = arith.constant 0 : i32
    %c0_i32_0 = arith.constant 0 : i32
    %c0_i32_1 = arith.constant 0 : i32
    return %c0_i32, %c0_i32_0 : i32, i32
  }
  func.func @transform_2(%arg0: i32) -> (i32, i32) {
    %c0_i32 = arith.constant 0 : i32
    %c0_i32_0 = arith.constant 0 : i32
    %c0_i32_1 = arith.constant 0 : i32
    return %c0_i32, %c0_i32_0 : i32, i32
  }
  func.func @transform_3(%arg0: i32) -> (i32, i32) {
    %c0_i32 = arith.constant 0 : i32
    %c0_i32_0 = arith.constant 0 : i32
    %c0_i32_1 = arith.constant 0 : i32
    return %c0_i32, %c0_i32_0 : i32, i32
  }
  func.func @transform_4(%arg0: i32) -> (i32, i32) {
    %c0_i32 = arith.constant 0 : i32
    %c0_i32_0 = arith.constant 0 : i32
    %c0_i32_1 = arith.constant 0 : i32
    return %c0_i32, %c0_i32_0 : i32, i32
  }
  func.func @transform_5(%arg0: i32) -> (i32, i32) {
    %c0_i32 = arith.constant 0 : i32
    %c0_i32_0 = arith.constant 0 : i32
    return %arg0, %c0_i32 : i32, i32
  }
}

</mosaic_0001>

<bundles_post_ra>
// kernel: tpu_custom_call.1
= control target key start
LH: loop header
LB: loop body
LE: loop exit
PB: predicated region body
PF: predicated region fallthrough
CT: control target
= control target key end

     0   :  { %v308_v1 = vmov 0.0   ;;  %vm47_vm0 = vcmask 1042432   ;;  %vm309_vm1 = vmmov 0   ;;  %vm43_vm2 = vcmask 179200   ;;  %s383_s0 = inlined_call_operand.vmem [shape: f32[8,22], index: 0, kind: input, shape index: {}]   ;;  %s384_s1 = inlined_call_operand.vmem [shape: bf16[22,128], index: 1, kind: input, shape index: {}]   ;;  %s385_s2 = inlined_call_operand.vmem [shape: f32[1,128], index: 2, kind: input, shape index: {}]   ;;  %s386_s3 = inlined_call_operand.vmem [shape: bf16[128,10], index: 3, kind: input, shape index: {}]   ;;  %s387_s4 = inlined_call_operand.vmem [shape: f32[1,10], index: 4, kind: input, shape index: {}]   ;;  %s388_s5 = inlined_call_operand.hbm [shape: f32[8,10], index: 5, kind: output, shape index: {}]  }
   0x1   :  { %v276_v0 = vld [vmem:[%s384_s1 + $0x8] ss:$0 sps:$4 sm:$0x77]   ;;  %245 = vmatprep.subr.bf16.mxu0 %v308_v1  ;;  %253 = vmatprep.subr.bf16.mxu1 %v308_v1  ;;  %v277_v3 = vld [vmem:[%s384_s1] sm:$0xff]   ;;  %v278_v5 = vld [vmem:[%s386_s3 + $0x38] sm:$0xff]  }
   0x2   :  { %v49_v2 = vsel %vm47_vm0, %v276_v0, 0  ;;  %v22_v4 = vld [vmem:[%s383_s0] sm:$0xff]  ;;  %249 = vmatprep.mubr.msk.bf16.mxu0 %vm309_vm1, %v308_v1  ;;  %269 = vmatprep.mubr.msk.bf16.mxu1 %vm309_vm1, %v308_v1  ;;  %v279_v6 = vld [vmem:[%s386_s3 + $0x30] sm:$0xff]   ;;  %v280_v8 = vld [vmem:[%s386_s3 + $0x28] sm:$0xff]  }
   0x3   :  { %246 = vmatpush3.bf16.msra.mxu0 %v49_v2  ;;  %254 = vmatpush3.bf16.msra.mxu1 %v278_v5  ;;  %v23_v7 = vpack.c.bf16 %v22_v4, %v22_v4 }
   0x4   :  { %247 = vmatprep.subr.bf16.mxu0 %v308_v1  ;;  %255 = vmatprep.subr.bf16.mxu1 %v308_v1 }
   0x7   :  { %248 = vmatpush3.bf16.msra.mxu0 %v277_v3  ;;  %256 = vmatpush3.bf16.msra.mxu1 %v279_v6 }
   0x8   :  { %257 = vmatprep.subr.bf16.mxu1 %v308_v1 }
   0xa   :  { %250 = vmatmul.mubr.msk.bf16.vlgmr.msra.gmra.mxu0 %vm43_vm2, %v23_v7 }
   0xb   :  { %10 = vsyncpa [#allocation3], 0  ;;  %258 = vmatpush3.bf16.msra.mxu1 %v280_v8  ;;  %v281_v9 = vld [vmem:[%s386_s3 + $0x20] sm:$0xff]   ;;  %v282_v10 = vld [vmem:[%s386_s3 + $0x18] sm:$0xff]   ;;  %s310_s17 = smov [#allocation2]   ;;  %vm204_vm3 = vcmask 80896  }
   0xc   :  { %259 = vmatprep.subr.bf16.mxu1 %v308_v1  ;;  %v283_v11 = vld [vmem:[%s386_s3 + $0x10] sm:$0xff]   ;;  %v284_v12 = vld [vmem:[%s386_s3 + $0x8] sm:$0xff]   ;;  %v285_v13 = vld [vmem:[%s386_s3] sm:$0xff]   ;;  %s212_s18 = sshll.u32 %s310_s17, 4  ;;  %s213_s18 = int_to_ptr.vmem [resolvable:$true] %s212_s18 }
   0xd   :  { %v220_v14 = vld [vmem:[%s385_s2] ss:$0 sm:$0xff]  ;;  %s286_s2 = scalar_lea.vmem %s213_s18, 128  ;;  %p291_p1 = scmp.lt.s32.totalorder %s213_s18, %s213_s18 }
   0xe   :  { %v224_v22 = vld [vmem:[%s387_s4] ss:$0 sm:$0xff]  ;;  %p287_p0 = scmp.ne.s32.totalorder %s213_s18, %s286_s2  ;;  %p292_p2 = scmp.lt.s32.totalorder %s286_s2, %s286_s2 }
   0xf   :  { %260 = vmatpush3.bf16.msra.mxu1 %v281_v9 }
  0x10   :  { %261 = vmatprep.subr.bf16.mxu1 %v308_v1  ;;  %p293_p3 = por %p292_p2, %p291_p1 }
  0x12   :  { %p294_p4 = pnand %p293_p3, %p287_p0 }
  0x13   :  { %262 = vmatpush3.bf16.msra.mxu1 %v282_v10 }
  0x14   :  { %263 = vmatprep.subr.bf16.mxu1 %v308_v1 }
  0x17   :  { %264 = vmatpush3.bf16.msra.mxu1 %v283_v11 }
  0x18   :  { %265 = vmatprep.subr.bf16.mxu1 %v308_v1 }
  0x1b   :  { %266 = vmatpush3.bf16.msra.mxu1 %v284_v12 }
  0x1c   :  { %267 = vmatprep.subr.bf16.mxu1 %v308_v1 }
  0x1f   :  { %268 = vmatpush3.bf16.msra.mxu1 %v285_v13 }
  0xca   :  { %v85_v15 = vpop.f32.mrf.mxu0 }
  0xcb   :  { %v86_v16 = vadd.f32 %v220_v14, %v85_v15 }
  0xcc   :  { %v251_v17 = vpop.f32.mrf.mxu0 }
  0xcd   :  { %v91_v18 = vmax.f32 %v86_v16, 0.0 }
  0xce   :  { %v88_v19 = vpop.f32.mrf.mxu0 }
  0xcf   :  { %v92_v20 = vpack.c.bf16 %v91_v18, %v91_v18 }
  0xd0   :  { %v252_v21 = vpop.f32.mrf.mxu0 }
  0xd1   :  { %270 = vmatmul.mubr.bf16.vlgmr.msra.gmra.mxu1 %v92_v20 }
 0x191   :  { %v198_v23 = vpop.f32.mrf.mxu1 }
 0x192   :  { %v199_v24 = vadd.f32 %v224_v22, %v198_v23 }
 0x193   :  { %v271_v25 = vpop.f32.mrf.mxu1 }
 0x194   :  { %205 = vst.msk [vmem:[#allocation2] sm:$0xff] %vm204_vm3, %v199_v24 }
 0x195   :  { %v201_v26 = vpop.f32.mrf.mxu1 }
 0x196   :  { %297 = shalt.err (!%p294_p4)
}
 0x197   :  { %215 = dma.vmem_to_hbm [thread:$0]  %s213_s18, 128, %s388_s5, [#allocation3]   ;;  %v272_v27 = vpop.f32.mrf.mxu1 }
 0x198   :  { %306 = dma.done.wait [#allocation3], 128  }
 0x199   :  { %307 = vsyncadd [#allocation3], 4294967168 }
 0x19a   :  { %219 = vsyncpa [#allocation3], 1 }

</bundles_post_ra>
